<compile_context>
chip_gen: v6e
topology: v6e:2x2x1
jax: 0.10.0
libtpu: 0.0.40
codegen_flags: <defaults>
</compile_context>

<pallas_src>
import jax
import jax.numpy as jnp
from jax import lax
from jax.experimental import pallas as pl
from jax.experimental.pallas import tpu as pltpu


# ---------------------------------------------------------------------------
# Fused kernel: accumulate N_m @ C over K tiles, then fold the elementwise
# terms and multiply by B^{-1} on the last K step.
# ---------------------------------------------------------------------------
def _fused_g_kernel(coef_ref, n_ref, c_ref, z_ref, y_ref, q_ref, u_ref,
                    gpre_ref, binv_ref, o_ref, acc_ref):
    k = pl.program_id(1)

    @pl.when(k == 0)
    def _init():
        acc_ref[...] = jnp.zeros_like(acc_ref)

    # MXU matmul on native-dtype operands (bf16 goes straight to the MXU),
    # accumulated in f32 VMEM scratch.
    acc_ref[...] += jnp.dot(n_ref[...], c_ref[...],
                            preferred_element_type=jnp.float32)

    @pl.when(k == pl.num_programs(1) - 1)
    def _finalize():
        # coef (SMEM, f32): [0.5*mu_i, 0.5*ni_i, alpha_i] (pre-halved on host)
        half_mu = coef_ref[0]
        half_ni = coef_ref[1]
        alpha = coef_ref[2]
        # Upcast the narrow R-wide streams on the VPU (no-op if already f32).
        a = (acc_ref[...]
             + half_mu * z_ref[...].astype(jnp.float32)
             + half_ni * q_ref[...].astype(jnp.float32)
             + alpha * gpre_ref[...].astype(jnp.float32)
             - 0.5 * (y_ref[...].astype(jnp.float32)
                      + u_ref[...].astype(jnp.float32)))
        # A never leaves VMEM: multiply by B^{-1} right away.
        o_ref[...] = jnp.dot(a, binv_ref[...],
                             preferred_element_type=jnp.float32)


# ---------------------------------------------------------------------------
# Per-generation VMEM budget / scoped limit / minimum number of M tiles.
# ---------------------------------------------------------------------------
def _hw_params():
    try:
        kind = jax.devices()[0].device_kind.lower()
    except Exception:
        kind = ""
    if "v7" in kind:
        # 64 MiB physical VMEM per TC, 2 TCs per chip: keep the budget under
        # the ceiling and force >=4 grid steps so both cores get work.
        return 40 * 1024 * 1024, 48 * 1024 * 1024, 4
    if ("v6" in kind) or ("v5e" in kind) or ("v5 lite" in kind) or ("v5lite" in kind):
        # 128 MiB physical VMEM: raise the scoped limit, allow 512-1024 row tiles.
        return 80 * 1024 * 1024, 100 * 1024 * 1024, 1
    # Unknown backend (incl. interpret mode): conservative numbers fit any chip.
    return 40 * 1024 * 1024, 48 * 1024 * 1024, 1


# ---------------------------------------------------------------------------
# Tile chooser: biggest M tile under the budget; split K only when the
# budget would otherwise force tile_m below ~256 (and only if the split
# divides K exactly -- the K axis is a reduction, partial K blocks are unsafe).
# ---------------------------------------------------------------------------
def _choose_tiles(M, K, R, n_isz, c_isz, side_isz_sum, granule, budget, min_tiles):
    def vmem_bytes(tm, tk):
        return (2 * n_isz * tm * tk            # N_m tile (double-buffered)
                + 2 * c_isz * tk * R           # C tile
                + 2 * side_isz_sum * tm * R    # Z, Y, Q, U, G_pre tiles
                + 2 * 4 * tm * R               # f32 output tile
                + 2 * 4 * R * R                # replicated B_inv
                + 4 * tm * R)                  # f32 accumulator scratch

    m_cap = pl.cdiv(M, granule) * granule
    tm_limit = 1024 if min_tiles <= 1 else 512
    tm_limit = min(tm_limit, m_cap)
    if min_tiles > 1:
        core_cap = max(granule, pl.cdiv(pl.cdiv(M, min_tiles), granule) * granule)
        tm_limit = min(tm_limit, core_cap)

    def largest_tm(tk):
        tm = tm_limit
        while tm > granule and vmem_bytes(tm, tk) > budget:
            tm = max(granule, (tm // 2) // granule * granule)
        return tm

    best_tm, best_tk = largest_tm(K), K
    if best_tm < min(256, tm_limit):
        for tk in (1024, 512, 256, 128):
            if tk >= K or K % tk != 0:   # only exact K splits (reduction axis)
                continue
            tm = largest_tm(tk)
            if tm > best_tm:
                best_tm, best_tk = tm, tk
            if best_tm >= min(256, tm_limit):
                break
    return int(best_tm), int(best_tk)


# ---------------------------------------------------------------------------
# Wrapper for the fused A-formation + A @ B_inv kernel.
# ---------------------------------------------------------------------------
def _fused_update(coef, N_m, C, Z, Y, Q, U, G_pre, B_inv,
                  tile_m=None, tile_k=None):
    M, K = N_m.shape
    R = C.shape[1]

    row_ops = (N_m, Z, Y, Q, U, G_pre)
    # Sublane granule of the most packed M-tiled operand (8 f32, 16 bf16).
    granule = max(8, 32 // min(x.dtype.itemsize for x in row_ops))

    budget, vmem_limit, min_tiles = _hw_params()
    auto_tm, auto_tk = _choose_tiles(
        M, K, R,
        N_m.dtype.itemsize, C.dtype.itemsize,
        sum(x.dtype.itemsize for x in (Z, Y, Q, U, G_pre)),
        granule, budget, min_tiles)

    if tile_m is None:
        tile_m = auto_tm
    else:
        tile_m = max(granule, (int(tile_m) // granule) * granule)
        tile_m = min(tile_m, pl.cdiv(M, granule) * granule)
    if tile_k is None:
        tile_k = auto_tk
    tile_k = int(tile_k)
    if tile_k != K:
        assert tile_k % 128 == 0 and K % tile_k == 0, (
            "tile_k must be a multiple of 128 that divides K exactly")

    n_m = pl.cdiv(M, tile_m)          # partial final M block handled by Pallas
    n_k = pl.cdiv(K, tile_k)          # exact by construction

    smem_spec = pl.BlockSpec(memory_space=pltpu.MemorySpace.SMEM)
    n_spec = pl.BlockSpec((tile_m, tile_k), lambda i, k: (i, k))
    c_spec = pl.BlockSpec((tile_k, R), lambda i, k: (k, 0))
    binv_spec = pl.BlockSpec((R, R), lambda i, k: (0, 0))

    def side_spec():                  # M-tiled R-wide operand (revisited over k)
        return pl.BlockSpec((tile_m, R), lambda i, k: (i, 0))

    flops = 2 * M * R * (K + R) + 6 * M * R
    bytes_accessed = (sum(x.size * x.dtype.itemsize for x in row_ops)
                      + C.size * C.dtype.itemsize
                      + B_inv.size * 4 + M * R * 4 + coef.size * 4)

    # NOTE: the small replicated operands (C, B_inv) could be single-buffered
    # (pipeline_mode=pl.Buffered(1)) to shave VMEM; skipped here since Pallas
    # already skips re-DMA for constant block indices and the saving is small.
    # TODO(synk): for production where R stays << 128, batch several layer
    # updates along the last dim to get lane-dense stores (small-R lane waste).
    out = pl.pallas_call(
        _fused_g_kernel,
        out_shape=jax.ShapeDtypeStruct((M, R), jnp.float32),
        grid_spec=pltpu.PrefetchScalarGridSpec(
            num_scalar_prefetch=0,
            grid=(n_m, n_k),
            in_specs=[smem_spec,        # coef (SMEM)
                      n_spec,           # N_m
                      c_spec,           # C
                      side_spec(),      # Z
                      side_spec(),      # Y
                      side_spec(),      # Q
                      side_spec(),      # U
                      side_spec(),      # G_pre
                      binv_spec],       # B_inv
            out_specs=pl.BlockSpec((tile_m, R), lambda i, k: (i, 0)),
            scratch_shapes=[pltpu.VMEM((tile_m, R), jnp.float32)],
        ),
        compiler_params=pltpu.CompilerParams(
            dimension_semantics=("parallel", "arbitrary"),
            vmem_limit_bytes=int(vmem_limit)),
        cost_estimate=pl.CostEstimate(flops=int(flops), transcendentals=0,
                                      bytes_accessed=int(bytes_accessed)),
    )(coef, N_m, C, Z, Y, Q, U, G_pre, B_inv)
    return out


# ---------------------------------------------------------------------------
# Module port
# ---------------------------------------------------------------------------
class UpdatingGLayer:
    """JAX/Pallas port of Updating_G_Layer (forward only)."""

    def __init__(self, alpha, ni, mu):
        self.alpha = jnp.asarray(alpha, dtype=jnp.float32)
        self.ni = jnp.asarray(ni, dtype=jnp.float32)
        self.mu = jnp.asarray(mu, dtype=jnp.float32)

    def __call__(self, N_m, C, r_now, r_next, G_pre_i, Q_m_i, Z_m_i, U_m_i,
                 Y_m_i, i, tile_m=None, tile_k=None):
        R = r_now * r_next
        assert C.shape[1] == R

        alpha_i = self.alpha[i]
        half_mu = 0.5 * self.mu[i]
        half_ni = 0.5 * self.ni[i]
        coef = jnp.stack([half_mu, half_ni, alpha_i]).astype(jnp.float32)

        # B = C^T C + lam*I -- tiny (R x R): computed in f32 in plain XLA,
        # contracted without an explicit transpose.
        lam = alpha_i + half_mu + half_ni
        C32 = C.astype(jnp.float32)
        ctc = lax.dot_general(C32, C32,
                              dimension_numbers=(((0,), (0,)), ((), ())),
                              precision=lax.Precision.HIGHEST,
                              preferred_element_type=jnp.float32)
        eye = jnp.eye(R, dtype=jnp.float32)
        B = ctc + lam * eye

        # B is SPD (Gram matrix + positive diagonal) -> Cholesky-based inverse.
        # TODO(synk): dense R x R Cholesky/inverse has no clean Pallas
        # primitive; it stays in XLA (cost negligible at R x R).
        cho = jax.scipy.linalg.cho_factor(B)
        B_inv = jax.scipy.linalg.cho_solve(cho, eye)

        # Inputs are passed in their NATIVE dtype (no host-side astype passes).
        return _fused_update(coef, N_m, C, Z_m_i, Y_m_i, Q_m_i, U_m_i,
                             G_pre_i, B_inv, tile_m=tile_m, tile_k=tile_k)


# ---------------------------------------------------------------------------
# Pure-JAX reference (mirrors the PyTorch forward)
# ---------------------------------------------------------------------------
def _reference(alpha, ni, mu, N_m, C, Z, Y, Q, U, G_pre, i):
    R = C.shape[1]
    f32 = jnp.float32
    N_m, C, Z, Y, Q, U, G_pre = (x.astype(f32) for x in (N_m, C, Z, Y, Q, U, G_pre))
    hp = lax.Precision.HIGHEST
    A = (jnp.dot(N_m, C, precision=hp)
         + 0.5 * mu[i] * Z - 0.5 * Y
         + 0.5 * ni[i] * Q - 0.5 * U + alpha[i] * G_pre)
    B = (jnp.dot(C.T, C, precision=hp)
         + (alpha[i] + 0.5 * mu[i] + 0.5 * ni[i]) * jnp.eye(R, dtype=f32))
    return jnp.dot(A, jnp.linalg.inv(B), precision=hp)


def _make_inputs(key, M, K, R, dtype):
    ks = jax.random.split(key, 7)
    mk = lambda kk, shape: jax.random.normal(kk, shape, dtype=jnp.float32).astype(dtype)
    N_m = mk(ks[0], (M, K))
    C = mk(ks[1], (K, R))
    G_pre = mk(ks[2], (M, R))
    Q = mk(ks[3], (M, R))
    Z = mk(ks[4], (M, R))
    U = mk(ks[5], (M, R))
    Y = mk(ks[6], (M, R))
    return N_m, C, G_pre, Q, Z, U, Y


# ---------------------------------------------------------------------------
# Demo / self-test
# ---------------------------------------------------------------------------
if __name__ == "__main__":
    alpha = jnp.array([0.10, 0.20, 0.30], dtype=jnp.float32)
    ni = jnp.array([0.05, 0.15, 0.25], dtype=jnp.float32)
    mu = jnp.array([0.40, 0.50, 0.60], dtype=jnp.float32)
    layer = UpdatingGLayer(alpha, ni, mu)
    i = 1
    r_now, r_next = 4, 4
    R = r_now * r_next

    # --- Test 1: f32, single M tile, auto tiling ----------------------------
    M, K = 32, 16
    N_m, C, G_pre, Q, Z, U, Y = _make_inputs(jax.random.PRNGKey(0), M, K, R,
                                             jnp.float32)
    G = layer(N_m, C, r_now, r_next, G_pre, Q, Z, U, Y, i)
    G = jax.block_until_ready(G)
    G_ref = _reference(alpha, ni, mu, N_m, C, Z, Y, Q, U, G_pre, i)
    assert G.shape == (M, R)
    assert jnp.allclose(G, G_ref, rtol=1e-3, atol=1e-3)

    # --- Test 2: f32, M not a multiple of tile_m (partial final block) ------
    M2 = 36
    N_m2, C2, G_pre2, Q2, Z2, U2, Y2 = _make_inputs(jax.random.PRNGKey(1),
                                                    M2, K, R, jnp.float32)
    G2 = layer(N_m2, C2, r_now, r_next, G_pre2, Q2, Z2, U2, Y2, i, tile_m=16)
    G2 = jax.block_until_ready(G2)
    G2_ref = _reference(alpha, ni, mu, N_m2, C2, Z2, Y2, Q2, U2, G_pre2, i)
    assert G2.shape == (M2, R)
    assert jnp.allclose(G2, G2_ref, rtol=1e-3, atol=1e-3)

    # --- Test 3: f32, K split (reduction grid axis) + partial M block -------
    M3, K3 = 40, 256
    N_m3, C3, G_pre3, Q3, Z3, U3, Y3 = _make_inputs(jax.random.PRNGKey(2),
                                                    M3, K3, R, jnp.float32)
    G3 = layer(N_m3, C3, r_now, r_next, G_pre3, Q3, Z3, U3, Y3, i,
               tile_m=16, tile_k=128)
    G3 = jax.block_until_ready(G3)
    G3_ref = _reference(alpha, ni, mu, N_m3, C3, Z3, Y3, Q3, U3, G_pre3, i)
    assert G3.shape == (M3, R)
    assert jnp.allclose(G3, G3_ref, rtol=1e-3, atol=1e-3)

    # --- Test 4: bf16 streamed natively (MXU bf16, in-kernel upcast) --------
    M4, K4 = 64, 32
    N_m4, C4, G_pre4, Q4, Z4, U4, Y4 = _make_inputs(jax.random.PRNGKey(3),
                                                    M4, K4, R, jnp.bfloat16)
    G4 = layer(N_m4, C4, r_now, r_next, G_pre4, Q4, Z4, U4, Y4, i)
    G4 = jax.block_until_ready(G4)
    G4_ref = _reference(alpha, ni, mu, N_m4, C4, Z4, Y4, Q4, U4, G_pre4, i)
    assert G4.shape == (M4, R) and G4.dtype == jnp.float32
    assert jnp.allclose(G4, G4_ref, rtol=2e-3, atol=2e-3)

    print("KERNEL_OK")
</pallas_src>

<mosaic_0001>
module attributes {stable_mosaic.version = 11 : i64} {
  func.func @_fused_g_kernel(%arg0: i32, %arg1: i32, %arg2: memref<3xf32, #tpu.memory_space<smem>>, %arg3: memref<32x16xf32, #tpu.memory_space<vmem>>, %arg4: memref<16x16xf32, #tpu.memory_space<vmem>>, %arg5: memref<32x16xf32, #tpu.memory_space<vmem>>, %arg6: memref<32x16xf32, #tpu.memory_space<vmem>>, %arg7: memref<32x16xf32, #tpu.memory_space<vmem>>, %arg8: memref<32x16xf32, #tpu.memory_space<vmem>>, %arg9: memref<32x16xf32, #tpu.memory_space<vmem>>, %arg10: memref<16x16xf32, #tpu.memory_space<vmem>>, %arg11: memref<32x16xf32, #tpu.memory_space<vmem>>, %arg12: memref<32x16xf32, #tpu.memory_space<vmem>>) attributes {dimension_semantics = [#tpu.dimension_semantics<parallel>, #tpu.dimension_semantics<arbitrary>], iteration_bounds = array<i64: 1, 1>, scalar_prefetch = 0 : i64, scratch_operands = 1 : i64, tpu.core_type = #tpu.core_type<tc>, window_params = [{transform_indices = @transform_0, window_bounds = array<i64: 3>}, {transform_indices = @transform_1, window_bounds = array<i64: 32, 16>}, {transform_indices = @transform_2, window_bounds = array<i64: 16, 16>}, {transform_indices = @transform_3, window_bounds = array<i64: 32, 16>}, {transform_indices = @transform_4, window_bounds = array<i64: 32, 16>}, {transform_indices = @transform_5, window_bounds = array<i64: 32, 16>}, {transform_indices = @transform_6, window_bounds = array<i64: 32, 16>}, {transform_indices = @transform_7, window_bounds = array<i64: 32, 16>}, {pipeline_mode = #tpu.pipeline_mode<synchronous>, transform_indices = @transform_8, window_bounds = array<i64: 16, 16>}, {transform_indices = @transform_9, window_bounds = array<i64: 32, 16>}]} {
    %c0_i32 = arith.constant 0 : i32
    %0 = arith.cmpi eq, %arg1, %c0_i32 : i32
    %1 = arith.extui %0 : i1 to i32
    %c0_i32_0 = arith.constant 0 : i32
    %2 = arith.cmpi ne, %1, %c0_i32_0 : i32
    scf.if %2 {
      %cst_10 = arith.constant 0.000000e+00 : f32
      %12 = vector.broadcast %cst_10 : f32 to vector<32x16xf32>
      %c0_11 = arith.constant 0 : index
      %c0_12 = arith.constant 0 : index
      %13 = vector.load %arg12[%c0_11, %c0_12] : memref<32x16xf32, #tpu.memory_space<vmem>>, vector<32x16xf32>
      tpu.vector_store %arg12[%c0_11, %c0_12], %12 {strides = array<i32>} : memref<32x16xf32, #tpu.memory_space<vmem>>, vector<32x16xf32>,
    } else {
    }
    %c0 = arith.constant 0 : index
    %c0_1 = arith.constant 0 : index
    %3 = vector.load %arg12[%c0, %c0_1] : memref<32x16xf32, #tpu.memory_space<vmem>>, vector<32x16xf32>
    %c0_2 = arith.constant 0 : index
    %c0_3 = arith.constant 0 : index
    %4 = vector.load %arg3[%c0_2, %c0_3] : memref<32x16xf32, #tpu.memory_space<vmem>>, vector<32x16xf32>
    %c0_4 = arith.constant 0 : index
    %c0_5 = arith.constant 0 : index
    %5 = vector.load %arg4[%c0_4, %c0_5] : memref<16x16xf32, #tpu.memory_space<vmem>>, vector<16x16xf32>
    %cst = arith.constant dense<0.000000e+00> : vector<32x16xf32>
    %6 = tpu.matmul %4, %5, %cst {dimension_numbers = #tpu.dot_dimension_numbers<[1], [0], [0], [1], [0, 0, 1, 1], [], []>} : vector<32x16xf32>, vector<16x16xf32>, vector<32x16xf32> -> vector<32x16xf32>
    %7 = arith.addf %3, %6 : vector<32x16xf32>
    %c0_6 = arith.constant 0 : index
    %c0_7 = arith.constant 0 : index
    %8 = vector.load %arg12[%c0_6, %c0_7] : memref<32x16xf32, #tpu.memory_space<vmem>>, vector<32x16xf32>
    tpu.vector_store %arg12[%c0_6, %c0_7], %7 {strides = array<i32>} : memref<32x16xf32, #tpu.memory_space<vmem>>, vector<32x16xf32>,
    %c0_i32_8 = arith.constant 0 : i32
    %9 = arith.cmpi eq, %arg1, %c0_i32_8 : i32
    %10 = arith.extui %9 : i1 to i32
    %c0_i32_9 = arith.constant 0 : i32
    %11 = arith.cmpi ne, %10, %c0_i32_9 : i32
    scf.if %11 {
      %c0_10 = arith.constant 0 : index
      %12 = memref.load %arg2[%c0_10] : memref<3xf32, #tpu.memory_space<smem>>
      %c1 = arith.constant 1 : index
      %13 = memref.load %arg2[%c1] : memref<3xf32, #tpu.memory_space<smem>>
      %c2 = arith.constant 2 : index
      %14 = memref.load %arg2[%c2] : memref<3xf32, #tpu.memory_space<smem>>
      %c0_11 = arith.constant 0 : index
      %c0_12 = arith.constant 0 : index
      %15 = vector.load %arg12[%c0_11, %c0_12] : memref<32x16xf32, #tpu.memory_space<vmem>>, vector<32x16xf32>
      %c0_13 = arith.constant 0 : index
      %c0_14 = arith.constant 0 : index
      %16 = vector.load %arg5[%c0_13, %c0_14] : memref<32x16xf32, #tpu.memory_space<vmem>>, vector<32x16xf32>
      %17 = vector.broadcast %12 : f32 to vector<32x16xf32>
      %18 = arith.mulf %17, %16 : vector<32x16xf32>
      %19 = arith.addf %15, %18 : vector<32x16xf32>
      %c0_15 = arith.constant 0 : index
      %c0_16 = arith.constant 0 : index
      %20 = vector.load %arg7[%c0_15, %c0_16] : memref<32x16xf32, #tpu.memory_space<vmem>>, vector<32x16xf32>
      %21 = vector.broadcast %13 : f32 to vector<32x16xf32>
      %22 = arith.mulf %21, %20 : vector<32x16xf32>
      %23 = arith.addf %19, %22 : vector<32x16xf32>
      %c0_17 = arith.constant 0 : index
      %c0_18 = arith.constant 0 : index
      %24 = vector.load %arg9[%c0_17, %c0_18] : memref<32x16xf32, #tpu.memory_space<vmem>>, vector<32x16xf32>
      %25 = vector.broadcast %14 : f32 to vector<32x16xf32>
      %26 = arith.mulf %25, %24 : vector<32x16xf32>
      %27 = arith.addf %23, %26 : vector<32x16xf32>
      %c0_19 = arith.constant 0 : index
      %c0_20 = arith.constant 0 : index
      %28 = vector.load %arg6[%c0_19, %c0_20] : memref<32x16xf32, #tpu.memory_space<vmem>>, vector<32x16xf32>
      %c0_21 = arith.constant 0 : index
      %c0_22 = arith.constant 0 : index
      %29 = vector.load %arg8[%c0_21, %c0_22] : memref<32x16xf32, #tpu.memory_space<vmem>>, vector<32x16xf32>
      %30 = arith.addf %28, %29 : vector<32x16xf32>
      %cst_23 = arith.constant 5.000000e-01 : f32
      %31 = vector.broadcast %cst_23 : f32 to vector<32x16xf32>
      %32 = arith.mulf %31, %30 : vector<32x16xf32>
      %33 = arith.subf %27, %32 : vector<32x16xf32>
      %c0_24 = arith.constant 0 : index
      %c0_25 = arith.constant 0 : index
      %34 = vector.load %arg10[%c0_24, %c0_25] : memref<16x16xf32, #tpu.memory_space<vmem>>, vector<16x16xf32>
      %cst_26 = arith.constant dense<0.000000e+00> : vector<32x16xf32>
      %35 = tpu.matmul %33, %34, %cst_26 {dimension_numbers = #tpu.dot_dimension_numbers<[1], [0], [0], [1], [0, 0, 1, 1], [], []>} : vector<32x16xf32>, vector<16x16xf32>, vector<32x16xf32> -> vector<32x16xf32>
      %c0_27 = arith.constant 0 : index
      %c0_28 = arith.constant 0 : index
      %36 = vector.load %arg11[%c0_27, %c0_28] : memref<32x16xf32, #tpu.memory_space<vmem>>, vector<32x16xf32>
      tpu.vector_store %arg11[%c0_27, %c0_28], %35 {strides = array<i32>} : memref<32x16xf32, #tpu.memory_space<vmem>>, vector<32x16xf32>,
    } else {
    }
    return
  }
  func.func @transform_0(%arg0: i32, %arg1: i32) -> i32 {
    %c0_i32 = arith.constant 0 : i32
    %c0_i32_0 = arith.constant 0 : i32
    return %c0_i32 : i32
  }
  func.func @transform_1(%arg0: i32, %arg1: i32) -> (i32, i32) {
    %c0_i32 = arith.constant 0 : i32
    return %arg0, %arg1 : i32, i32
  }
  func.func @transform_2(%arg0: i32, %arg1: i32) -> (i32, i32) {
    %c0_i32 = arith.constant 0 : i32
    %c0_i32_0 = arith.constant 0 : i32
    return %arg1, %c0_i32 : i32, i32
  }
  func.func @transform_3(%arg0: i32, %arg1: i32) -> (i32, i32) {
    %c0_i32 = arith.constant 0 : i32
    %c0_i32_0 = arith.constant 0 : i32
    return %arg0, %c0_i32 : i32, i32
  }
  func.func @transform_4(%arg0: i32, %arg1: i32) -> (i32, i32) {
    %c0_i32 = arith.constant 0 : i32
    %c0_i32_0 = arith.constant 0 : i32
    return %arg0, %c0_i32 : i32, i32
  }
  func.func @transform_5(%arg0: i32, %arg1: i32) -> (i32, i32) {
    %c0_i32 = arith.constant 0 : i32
    %c0_i32_0 = arith.constant 0 : i32
    return %arg0, %c0_i32 : i32, i32
  }
  func.func @transform_6(%arg0: i32, %arg1: i32) -> (i32, i32) {
    %c0_i32 = arith.constant 0 : i32
    %c0_i32_0 = arith.constant 0 : i32
    return %arg0, %c0_i32 : i32, i32
  }
  func.func @transform_7(%arg0: i32, %arg1: i32) -> (i32, i32) {
    %c0_i32 = arith.constant 0 : i32
    %c0_i32_0 = arith.constant 0 : i32
    return %arg0, %c0_i32 : i32, i32
  }
  func.func @transform_8(%arg0: i32, %arg1: i32) -> (i32, i32) {
    %c0_i32 = arith.constant 0 : i32
    %c0_i32_0 = arith.constant 0 : i32
    %c0_i32_1 = arith.constant 0 : i32
    return %c0_i32, %c0_i32_0 : i32, i32
  }
  func.func @transform_9(%arg0: i32, %arg1: i32) -> (i32, i32) {
    %c0_i32 = arith.constant 0 : i32
    %c0_i32_0 = arith.constant 0 : i32
    return %arg0, %c0_i32 : i32, i32
  }
}

</mosaic_0001>

<bundles_post_ra>
// kernel: tpu_custom_call.1
= control target key start
LH: loop header
LB: loop body
LE: loop exit
PB: predicated region body
PF: predicated region fallthrough
CT: control target
= control target key end

     0   :  { %14 = vsyncpa [#allocation4], 0  ;;  %s576_s0 = inlined_call_operand.vmem [shape: f32[3], index: 0, kind: input, shape index: {}]   ;;  %s577_s1 = inlined_call_operand.vmem [shape: f32[32,16], index: 1, kind: input, shape index: {}]   ;;  %s578_s2 = inlined_call_operand.vmem [shape: f32[16,16], index: 2, kind: input, shape index: {}]   ;;  %s579_s3 = inlined_call_operand.vmem [shape: f32[32,16], index: 3, kind: input, shape index: {}]   ;;  %s580_s4 = inlined_call_operand.vmem [shape: f32[32,16], index: 4, kind: input, shape index: {}]   ;;  %s581_s5 = inlined_call_operand.vmem [shape: f32[32,16], index: 5, kind: input, shape index: {}]   ;;  %s582_s6 = inlined_call_operand.vmem [shape: f32[32,16], index: 6, kind: input, shape index: {}]   ;;  %s583_s7 = inlined_call_operand.vmem [shape: f32[32,16], index: 7, kind: input, shape index: {}]   ;;  %s584_s8 = inlined_call_operand.vmem [shape: f32[16,16], index: 8, kind: input, shape index: {}]   ;;  %s585_s9 = inlined_call_operand.vmem [shape: f32[32,16], index: 9, kind: output, shape index: {}]  }
   0x1   :  { %s21_s11 = sshll.u32 %s576_s0, 4  ;;  %s22_s11 = int_to_ptr.vmem [resolvable:$true] %s21_s11 }
   0x2   :  { %s391_s12 = scalar_lea.vmem %s22_s11, 16  ;;  %p396_p1 = scmp.lt.s32.totalorder %s22_s11, %s22_s11 }
   0x3   :  { %p392_p0 = scmp.ne.s32.totalorder %s22_s11, %s391_s12  ;;  %p397_p2 = scmp.lt.s32.totalorder %s391_s12, %s391_s12 }
   0x5   :  { %p398_p3 = por %p397_p2, %p396_p1 }
   0x7   :  { %p399_p4 = pnand %p398_p3, %p392_p0 }
   0x9   :  { %402 = shalt.err (!%p399_p4)
}
   0xa   :  { %s405_s13 = smov [#allocation3]  }
   0xb   :  { %24 = dma.vmem_to_smem %s22_s11, 16, %s405_s13, [#allocation4]  }
   0xc   :  { %403 = dma.done.wait [#allocation4], 16  }
   0xd   :  { %404 = vsyncadd [#allocation4], 4294967280 }
   0xe   :  { %44 = sfence }
   0xf   :  { %v63_v0 = vld [vmem:[%s578_s2 + $0x8] sm:$0xff]  ;;  %v62_v1 = vld [vmem:[%s578_s2] sm:$0xff]  ;;  %vm49_vm0 = vcmask 130048   ;;  %v406_v3 = vmov 0.0   ;;  %v60_v5 = vld [vmem:[%s577_s1 + $0x10] sm:$0xff]  ;;  %s173_s28 = sld [smem:[#allocation3]] }
  0x10   :  { %v58_v2 = vld [vmem:[%s577_s1] sm:$0xff]  ;;  %369 = vmatprep.subr.mxu0 %v63_v0  ;;  %51 = vst.msk [vmem:[#allocation2 + $0x8] sm:$0xff] %vm49_vm0, %v406_v3  ;;  %50 = vst.msk [vmem:[#allocation2] sm:$0xff] %vm49_vm0, %v406_v3  ;;  %v59_v4 = vld [vmem:[%s577_s1 + $0x8] sm:$0xff]  ;;  %s351_s29 = sld [smem:[#allocation3 + $0x1]] }
  0x11   :  { %373 = vmatprep.mubr.msk.f32.mxu0 %vm49_vm0, %v58_v2  ;;  %52 = vst.msk [vmem:[#allocation2 + $0x10] sm:$0xff] %vm49_vm0, %v406_v3  ;;  %53 = vst.msk [vmem:[#allocation2 + $0x18] sm:$0xff] %vm49_vm0, %v406_v3  ;;  %370 = vmatpush3.msra.mxu0 %v63_v0  ;;  %v61_v6 = vld [vmem:[%s577_s1 + $0x18] sm:$0xff]  ;;  %v240_v7 = vld [vmem:[%s584_s8 + $0x8] sm:$0xff]  ;;  %s352_s1 = sld [smem:[#allocation3 + $0x2]] }
  0x12   :  { %371 = vmatprep.subr.mxu0 %v62_v1  ;;  %v239_v8 = vld [vmem:[%s584_s8] sm:$0xff]  ;;  %379 = vmatprep.subr.mxu1 %v240_v7  ;;  %v181_v19 = vld [vmem:[%s579_s3 + $0x8] sm:$0xff]  ;;  %v183_v31 = vld [vmem:[%s579_s3 + $0x18] sm:$0xff] }
  0x13   :  { %372 = vmatpush3.msra.mxu0 %v62_v1  ;;  %380 = vmatpush3.msra.mxu1 %v240_v7  ;;  %v180_v22 = vld [vmem:[%s579_s3] sm:$0xff]  ;;  %v194_v24 = vld [vmem:[%s581_s5 + $0x8] sm:$0xff]  ;;  %v182_v40 = vld [vmem:[%s579_s3 + $0x10] sm:$0xff] }
  0x14   :  { %374 = vmatmul.mubr.msk.f32.vlgmr.msra.gmra.mxu0 %vm49_vm0, %v59_v4  ;;  %381 = vmatprep.subr.mxu1 %v239_v8  ;;  %v219_v26 = vld [vmem:[%s580_s4] sm:$0xff]  ;;  %v207_v30 = vld [vmem:[%s583_s7 + $0x8] sm:$0xff]  ;;  %v196_v41 = vld [vmem:[%s581_s5 + $0x18] sm:$0xff] }
  0x15   :  { %376 = vmatprep.mubr.msk.f32.mxu0 %vm49_vm0, %v60_v5  ;;  %382 = vmatpush3.msra.mxu1 %v239_v8  ;;  %v184_v18 = vstv %s173_s28  ;;  %v223_v27 = vld [vmem:[%s582_s6] sm:$0xff]  ;;  %v220_v36 = vld [vmem:[%s580_s4 + $0x8] sm:$0xff]  ;;  %v195_v44 = vld [vmem:[%s581_s5 + $0x10] sm:$0xff] }
  0x16   :  { %v197_v23 = vstv %s351_s29  ;;  %v186_v28 = vmul.f32 %v184_v18, %v181_v19  ;;  %v193_v29 = vld [vmem:[%s581_s5] sm:$0xff]  ;;  %v185_v32 = vmul.f32 %v184_v18, %v180_v22  ;;  %v224_v37 = vld [vmem:[%s582_s6 + $0x8] sm:$0xff]  ;;  %v227_v38 = vadd.f32 %v223_v27, %v219_v26  ;;  %v221_v50 = vld [vmem:[%s580_s4 + $0x10] sm:$0xff] }
  0x17   :  { %v55_v9 = vld [vmem:[#allocation2 + $0x8] sm:$0xff]  ;;  %v54_v11 = vld [vmem:[#allocation2] sm:$0xff]  ;;  %v210_v34 = vstv %s352_s1  ;;  %v199_v35 = vmul.f32 %v197_v23, %v194_v24  ;;  %v198_v42 = vmul.f32 %v197_v23, %v193_v29  ;;  %v188_v45 = vmul.f32 %v184_v18, %v183_v31  ;;  %v225_v51 = vld [vmem:[%s582_s6 + $0x10] sm:$0xff] }
  0x18   :  { %377 = vmatmul.mubr.msk.f32.gmra.mxu0 %vm49_vm0, %v61_v6  ;;  %v57_v14 = vld [vmem:[#allocation2 + $0x18] sm:$0xff]  ;;  %v56_v17 = vld [vmem:[#allocation2 + $0x10] sm:$0xff]  ;;  %v206_v33 = vld [vmem:[%s583_s7] sm:$0xff]  ;;  %v212_v48 = vmul.f32 %v210_v34, %v207_v30  ;;  %v228_v49 = vadd.f32 %v224_v37, %v220_v36  ;;  %v187_v54 = vmul.f32 %v184_v18, %v182_v40  ;;  %v201_v55 = vmul.f32 %v197_v23, %v196_v41 }
  0x19   :  { %v211_v47 = vmul.f32 %v210_v34, %v206_v33  ;;  %v209_v56 = vld [vmem:[%s583_s7 + $0x18] sm:$0xff]  ;;  %v231_v59 = vmul.f32 0.5, %v227_v38  ;;  %v208_v60 = vld [vmem:[%s583_s7 + $0x10] sm:$0xff]  ;;  %v200_v63 = vmul.f32 %v197_v23, %v195_v44  ;;  %v229_v0 = vadd.f32 %v225_v51, %v221_v50 }
  0x1a   :  { %v222_v57 = vld [vmem:[%s580_s4 + $0x18] sm:$0xff]  ;;  %v232_v3 = vmul.f32 0.5, %v228_v49  ;;  %v214_v5 = vmul.f32 %v210_v34, %v209_v56 }
  0x1b   :  { %v226_v58 = vld [vmem:[%s582_s6 + $0x18] sm:$0xff] }
  0x1c   :  { %v230_v6 = vadd.f32 %v226_v58, %v222_v57 }
  0xd4   :  { %v375_v10 = vpop.f32.mrf.mxu0 }
  0xd5   :  { %v163_v12 = vadd.f32 %v375_v10, %v55_v9  ;;  %v213_v9 = vmul.f32 %v210_v34, %v208_v60 }
  0xd6   :  { %v143_v13 = vpop.f32.mrf.mxu0 }
  0xd7   :  { %167 = vst.msk [vmem:[#allocation2 + $0x8] sm:$0xff] %vm49_vm0, %v163_v12  ;;  %v162_v15 = vadd.f32 %v143_v13, %v54_v11  ;;  %v233_v13 = vmul.f32 0.5, %v229_v0 }
  0xd8   :  { %v378_v16 = vpop.f32.mrf.mxu0 }
  0xd9   :  { %166 = vst.msk [vmem:[#allocation2] sm:$0xff] %vm49_vm0, %v162_v15  ;;  %v165_v20 = vadd.f32 %v378_v16, %v57_v14  ;;  %v234_v16 = vmul.f32 0.5, %v230_v6 }
  0xda   :  { %v153_v21 = vpop.f32.mrf.mxu0 }
  0xdb   :  { %169 = vst.msk [vmem:[#allocation2 + $0x18] sm:$0xff] %vm49_vm0, %v165_v20  ;;  %v164_v25 = vadd.f32 %v153_v21, %v56_v17 }
  0xdd   :  { %168 = vst.msk [vmem:[#allocation2 + $0x10] sm:$0xff] %vm49_vm0, %v164_v25 }
  0xde   :  { %v177_v39 = vld [vmem:[#allocation2 + $0x8] sm:$0xff] }
  0xdf   :  { %v190_v43 = vadd.f32 %v186_v28, %v177_v39 }
  0xe0   :  { %v176_v46 = vld [vmem:[#allocation2] sm:$0xff] }
  0xe1   :  { %v189_v52 = vadd.f32 %v185_v32, %v176_v46  ;;  %v203_v53 = vadd.f32 %v199_v35, %v190_v43 }
  0xe2   :  { %v179_v61 = vld [vmem:[#allocation2 + $0x18] sm:$0xff] }
  0xe3   :  { %v202_v62 = vadd.f32 %v198_v42, %v189_v52  ;;  %v192_v1 = vadd.f32 %v188_v45, %v179_v61  ;;  %v216_v2 = vadd.f32 %v212_v48, %v203_v53 }
  0xe4   :  { %v178_v4 = vld [vmem:[#allocation2 + $0x10] sm:$0xff] }
  0xe5   :  { %v215_v7 = vadd.f32 %v211_v47, %v202_v62  ;;  %v191_v8 = vadd.f32 %v187_v54, %v178_v4  ;;  %v205_v10 = vadd.f32 %v201_v55, %v192_v1  ;;  %v236_v14 = vsub.f32 %v216_v2, %v232_v3 }
  0xe7   :  { %v235_v11 = vsub.f32 %v215_v7, %v231_v59  ;;  %v204_v12 = vadd.f32 %v200_v63, %v191_v8  ;;  %v218_v15 = vadd.f32 %v214_v5, %v205_v10 }
  0xe9   :  { %383 = vmatprep.mubr.msk.f32.mxu1 %vm49_vm0, %v235_v11  ;;  %v217_v17 = vadd.f32 %v213_v9, %v204_v12  ;;  %v238_v19 = vsub.f32 %v218_v15, %v234_v16 }
  0xea   :  { %384 = vmatmul.mubr.msk.f32.vlgmr.msra.gmra.mxu1 %vm49_vm0, %v236_v14 }
  0xeb   :  { %v237_v18 = vsub.f32 %v217_v17, %v233_v13 }
  0xed   :  { %386 = vmatprep.mubr.msk.f32.mxu1 %vm49_vm0, %v237_v18 }
  0xee   :  { %387 = vmatmul.mubr.msk.f32.gmra.mxu1 %vm49_vm0, %v238_v19 }
 0x1aa   :  { %v385_v20 = vpop.f32.mrf.mxu1 }
 0x1ab   :  { %339 = vst.msk [vmem:[%s585_s9 + $0x8] sm:$0xff] %vm49_vm0, %v385_v20 }
 0x1ac   :  { %v319_v21 = vpop.f32.mrf.mxu1 }
 0x1ad   :  { %338 = vst.msk [vmem:[%s585_s9] sm:$0xff] %vm49_vm0, %v319_v21 }
 0x1ae   :  { %v388_v22 = vpop.f32.mrf.mxu1 }
 0x1af   :  { %341 = vst.msk [vmem:[%s585_s9 + $0x18] sm:$0xff] %vm49_vm0, %v388_v22 }
 0x1b0   :  { %v329_v23 = vpop.f32.mrf.mxu1 }
 0x1b1   :  { %340 = vst.msk [vmem:[%s585_s9 + $0x10] sm:$0xff] %vm49_vm0, %v329_v23 }
 0x1b2   :  { %346 = vsyncpa [#allocation4], 1 }

</bundles_post_ra>
